<compile_context>
chip_gen: v7x
topology: tpu7x:2x2x1
jax: 0.10.0
libtpu: 0.0.40
codegen_flags: <defaults>
</compile_context>

<pallas_src>
import functools

import jax
import jax.numpy as jnp
from jax import lax
from jax.experimental import pallas as pl
from jax.experimental.pallas import tpu as pltpu


# --------------------------------------------------------------------------
# Kernels
# --------------------------------------------------------------------------

def _addmm_self_single_kernel(bias_ref, x_ref, o_ref, *, precision, cast_bf16):
    """o = bias + x @ x, single shot (everything resident in VMEM)."""
    x = x_ref[...]
    if cast_bf16:
        x = x.astype(jnp.bfloat16)
    acc = jnp.dot(x, x, preferred_element_type=jnp.float32, precision=precision)
    o_ref[...] = (acc + bias_ref[...].astype(jnp.float32)).astype(o_ref.dtype)


def _addmm_self_tiled_kernel(bias_ref, xl_ref, xr_ref, o_ref, acc_ref, *,
                             precision, cast_bf16):
    """Tiled o = bias + x @ x with f32 accumulator scratch (reduction axis last)."""
    @pl.when(pl.program_id(2) == 0)
    def _():
        acc_ref[...] = jnp.zeros_like(acc_ref)

    a = xl_ref[...]
    b = xr_ref[...]
    if cast_bf16:
        a = a.astype(jnp.bfloat16)
        b = b.astype(jnp.bfloat16)
    acc_ref[...] += jnp.dot(a, b, preferred_element_type=jnp.float32,
                            precision=precision)

    @pl.when(pl.program_id(2) == pl.num_programs(2) - 1)
    def _():
        o_ref[...] = (acc_ref[...]
                      + bias_ref[...].astype(jnp.float32)).astype(o_ref.dtype)


# --------------------------------------------------------------------------
# Wrapper
# --------------------------------------------------------------------------

# Single-shot working-set budget: leave headroom under the 32 MiB default
# scoped VMEM limit (v7x physical VMEM is only 64 MiB, half of v5e/v6e).
_VMEM_SINGLE_SHOT_BUDGET = 24 * 1024 * 1024


def addmm_self(bias, x, *,
               precision=lax.Precision.DEFAULT,
               cast_to_bf16=False,
               tm=256, tn=256, tk=256):
    """Pallas TPU implementation of torch.addmm(bias, x, x) = bias + x @ x.

    `x` must be square (K, K); `bias` must be broadcastable to (K, K).

    Numerical contract: with the default `precision=lax.Precision.DEFAULT` the
    MXU performs a single bf16 pass accumulated in f32 (the TPU default for
    f32 matmuls). Pass `precision=lax.Precision.HIGHEST` for true-f32
    emulation, or `cast_to_bf16=True` to make the bf16 operand cast explicit.
    """
    K, K2 = x.shape
    assert K == K2, "x must be square for x @ x"

    # Keep bias at its true shape (2D for TPU); broadcast inside the kernel.
    if bias.ndim == 1:
        bias = bias.reshape(1, -1)
    bM, bN = bias.shape
    assert bM in (1, K) and bN in (1, K), "bias must broadcast to (K, K)"

    itemsize = jnp.dtype(x.dtype).itemsize
    cost = pl.CostEstimate(
        flops=2 * K * K * K,
        transcendentals=0,
        bytes_accessed=(2 * K * K + bM * bN) * itemsize,  # x read + out write + bias
    )

    working_set = (2 * K * K + bM * bN) * itemsize  # x + out + bias, all resident

    if working_set <= _VMEM_SINGLE_SHOT_BUDGET:
        # ------------------------------------------------------------------
        # Single-shot path: whole problem in VMEM, x bound once and used for
        # both matmul operands, no grid (no pipeline overhead at this size).
        # ------------------------------------------------------------------
        aliases = {}
        if bias.shape == (K, K) and bias.dtype == x.dtype:
            aliases = {0: 0}  # reuse bias' HBM buffer as the output buffer

        kernel = functools.partial(_addmm_self_single_kernel,
                                   precision=precision,
                                   cast_bf16=cast_to_bf16)
        return pl.pallas_call(
            kernel,
            out_shape=jax.ShapeDtypeStruct((K, K), x.dtype),
            in_specs=[
                pl.BlockSpec((bM, bN), lambda: (0, 0)),  # bias, true shape
                pl.BlockSpec((K, K), lambda: (0, 0)),    # x (used twice in-kernel)
            ],
            out_specs=pl.BlockSpec((K, K), lambda: (0, 0)),
            cost_estimate=cost,
            input_output_aliases=aliases,
        )(bias, x)

    # ----------------------------------------------------------------------
    # Tiled fallback for large K (sized for v7x's 64 MiB VMEM): classic
    # (M, N, K) grid with f32 accumulator scratch; M/N axes "parallel" so v7x
    # shards across its 2 TensorCores, reduction axis "arbitrary" and last.
    # Tile sizes are multiples of 128 (v5e MXU) and 256 (v6e/v7x MXU).
    # ----------------------------------------------------------------------
    assert K % tm == 0 and K % tn == 0 and K % tk == 0, (
        "tiled path requires K divisible by tile sizes")

    bias_block = (tm if bM == K else 1, tn if bN == K else 1)

    def bias_map(i, j, k):
        return (i if bM == K else 0, j if bN == K else 0)

    kernel = functools.partial(_addmm_self_tiled_kernel,
                               precision=precision,
                               cast_bf16=cast_to_bf16)
    return pl.pallas_call(
        kernel,
        out_shape=jax.ShapeDtypeStruct((K, K), x.dtype),
        grid_spec=pltpu.PrefetchScalarGridSpec(
            num_scalar_prefetch=0,
            grid=(K // tm, K // tn, K // tk),
            in_specs=[
                pl.BlockSpec(bias_block, bias_map),
                pl.BlockSpec((tm, tk), lambda i, j, k: (i, k)),  # lhs = x
                pl.BlockSpec((tk, tn), lambda i, j, k: (k, j)),  # rhs = x
            ],
            out_specs=pl.BlockSpec((tm, tn), lambda i, j, k: (i, j)),
            scratch_shapes=[pltpu.VMEM((tm, tn), jnp.float32)],
        ),
        compiler_params=pltpu.CompilerParams(
            dimension_semantics=("parallel", "parallel", "arbitrary")),
        cost_estimate=cost,
    )(bias, x, x)


def model_forward(x1, x2):
    v1 = addmm_self(x1, x2)   # torch.addmm(x1, x2, x2)
    return v1                 # torch.cat([v1], dim=1) on one tensor is identity


# --------------------------------------------------------------------------
# Self-test
# --------------------------------------------------------------------------

if __name__ == "__main__":
    key = jax.random.PRNGKey(0)
    k1, k2 = jax.random.split(key)

    N = 256  # small square size so addmm broadcasting is valid
    x1 = jax.random.normal(k1, (N, N), dtype=jnp.float32)
    x2 = jax.random.normal(k2, (N, N), dtype=jnp.float32)

    # reference computed first (plain JAX, same default MXU precision)
    ref = x1 + x2 @ x2

    out = model_forward(x1, x2)
    jax.block_until_ready(out)

    assert out.shape == (N, N)
    assert jnp.allclose(out, ref, atol=1e-3, rtol=1e-3)

    print("KERNEL_OK")
</pallas_src>

<mosaic_0001>
module attributes {stable_mosaic.version = 11 : i64} {
  func.func @_addmm_self_single_kernel(%arg0: memref<256x256xf32, #tpu.memory_space<vmem>>, %arg1: memref<256x256xf32, #tpu.memory_space<vmem>>, %arg2: memref<256x256xf32, #tpu.memory_space<vmem>>) attributes {dimension_semantics = [], scalar_prefetch = 0 : i64, scratch_operands = 0 : i64, tpu.core_type = #tpu.core_type<tc>} {
    %c0 = arith.constant 0 : index
    %c0_0 = arith.constant 0 : index
    %0 = vector.load %arg1[%c0, %c0_0] : memref<256x256xf32, #tpu.memory_space<vmem>>, vector<256x256xf32>
    %cst = arith.constant dense<0.000000e+00> : vector<256x256xf32>
    %1 = tpu.matmul %0, %0, %cst {dimension_numbers = #tpu.dot_dimension_numbers<[1], [0], [0], [1], [0, 0, 1, 1], [], []>} : vector<256x256xf32>, vector<256x256xf32>, vector<256x256xf32> -> vector<256x256xf32>
    %c0_1 = arith.constant 0 : index
    %c0_2 = arith.constant 0 : index
    %2 = vector.load %arg0[%c0_1, %c0_2] : memref<256x256xf32, #tpu.memory_space<vmem>>, vector<256x256xf32>
    %3 = arith.addf %1, %2 : vector<256x256xf32>
    %c0_3 = arith.constant 0 : index
    %c0_4 = arith.constant 0 : index
    %4 = vector.load %arg2[%c0_3, %c0_4] : memref<256x256xf32, #tpu.memory_space<vmem>>, vector<256x256xf32>
    tpu.vector_store %arg2[%c0_3, %c0_4], %3 {strides = array<i32>} : memref<256x256xf32, #tpu.memory_space<vmem>>, vector<256x256xf32>,
    return
  }
}

</mosaic_0001>

<bundles_post_ra>
// kernel: tpu_custom_call.1
= control target key start
LH: loop header
LB: loop body
LE: loop exit
PB: predicated region body
PF: predicated region fallthrough
CT: control target
= control target key end

     0   :  { %7 = vsyncpa [#allocation3], 0  ;;  %s1129_s0 = inlined_call_operand.hbm [shape: f32[256,256], index: 0, kind: input, shape index: {}, may-alias: {0,2}]   ;;  %s1130_s1 = inlined_call_operand.vmem [shape: f32[256,256], index: 1, kind: input, shape index: {}]   ;;  %s1131_s2 = inlined_call_operand.hbm [shape: f32[256,256], index: 2, kind: output, shape index: {}, may-alias: {0,2}]  }
   0x1   :  { %8 = vsyncpa [#allocation4], 0  ;;  %s640_s9 = smov [#allocation2]   ;;  %s592_s13 = scalar_lea.hbm %s1129_s0, 8192 }
   0x2   :  { %s14_s10 = sshll.u32 %s640_s9, 4  ;;  %p593_p0 = scmp.ne.s32.totalorder %s1129_s0, %s592_s13  ;;  %s15_s10 = int_to_ptr.vmem [resolvable:$true] %s14_s10 }
   0x3   :  { %p596_p1 = scmp.lt.u32.totalorder %s592_s13, %s1129_s0 }
   0x5   :  { %p598_p2 = pnand %p596_p1, %p593_p0 }
   0x7   :  { %601 = shalt.err (!%p598_p2)
}
   0x8   :  { %s602_s18 = scalar_lea.vmem %s15_s10, 8192  ;;  %p607_p4 = scmp.lt.s32.totalorder %s15_s10, %s15_s10 }
   0x9   :  { %p603_p3 = scmp.ne.s32.totalorder %s15_s10, %s602_s18  ;;  %p608_p5 = scmp.lt.s32.totalorder %s602_s18, %s602_s18 }
   0xb   :  { %p609_p6 = por %p608_p5, %p607_p4 }
   0xd   :  { %p610_p7 = pnand %p609_p6, %p603_p3 }
   0xf   :  { %613 = shalt.err (!%p610_p7)
}
  0x10   :  { %s641_s19 = smov 256   ;;  %s642_s20 = smov 16  }
  0x11   :  { %20 = dma.hbm_to_vmem [thread:$0]  %s1129_s0, 8192, %s15_s10, [#allocation3], %s641_s19, %s641_s19, %s642_s20  }
  0x12   :  { %636 = dma.done.wait [#allocation3], 8192  }
  0x13   :  { %637 = vsyncadd [#allocation3], 4294959104  ;;  %v27_v0 = vld [vmem:[%s1130_s1 + $0x8] sm:$0xff]  ;;  %v680_v1 = vld [vmem:[%s1130_s1 + $0x18] sm:$0xff] }
  0x14   :  { %v685_v2 = vld [vmem:[%s1130_s1] sm:$0xff]  ;;  %v492_v3 = vpack.c.bf16 %v680_v1, %v27_v0  ;;  %v691_v4 = vld [vmem:[%s1130_s1 + $0x10] sm:$0xff]  ;;  %v696_v5 = vld [vmem:[%s1130_s1 + $0x28] sm:$0xff]  ;;  %218 = vmatprep.mubr.f32.mxu0 %v27_v0 }
  0x15   :  { %v701_v6 = vld [vmem:[%s1130_s1 + $0x38] sm:$0xff]  ;;  %v494_v7 = vpack.c.bf16 %v691_v4, %v685_v2  ;;  %v710_v9 = vld [vmem:[%s1130_s1 + $0x20] sm:$0xff]  ;;  %v715_v10 = vld [vmem:[%s1130_s1 + $0x30] sm:$0xff] }
  0x16   :  { %v496_v8 = vpack.c.bf16 %v701_v6, %v696_v5  ;;  %v720_v11 = vld [vmem:[%s1130_s1 + $0x48] sm:$0xff]  ;;  %493 = vmatprep.subr.bf16.mxu0 %v492_v3  ;;  %556 = vmatprep.subr.bf16.mxu1 %v492_v3  ;;  %v725_v12 = vld [vmem:[%s1130_s1 + $0x58] sm:$0xff]  ;;  %v498_v13 = vpack.c.bf16 %v715_v10, %v710_v9  ;;  %v734_v15 = vld [vmem:[%s1130_s1 + $0x40] sm:$0xff] }
  0x17   :  { %495 = vmatpush1.bf16.msra.mxu0 %v494_v7  ;;  %572 = vmatpush1.bf16.msra.mxu1 %v494_v7  ;;  %v500_v14 = vpack.c.bf16 %v725_v12, %v720_v11  ;;  %v739_v16 = vld [vmem:[%s1130_s1 + $0x50] sm:$0xff]  ;;  %v744_v17 = vld [vmem:[%s1130_s1 + $0x68] sm:$0xff]  ;;  %v749_v18 = vld [vmem:[%s1130_s1 + $0x78] sm:$0xff] }
  0x18   :  { %497 = vmatprep.subr.bf16.mxu0 %v496_v8  ;;  %557 = vmatprep.subr.bf16.mxu1 %v496_v8  ;;  %v502_v19 = vpack.c.bf16 %v739_v16, %v734_v15  ;;  %v504_v20 = vpack.c.bf16 %v749_v18, %v744_v17  ;;  %v758_v21 = vld [vmem:[%s1130_s1 + $0x60] sm:$0xff]  ;;  %v763_v22 = vld [vmem:[%s1130_s1 + $0x70] sm:$0xff]  ;;  %v768_v23 = vld [vmem:[%s1130_s1 + $0x88] sm:$0xff] }
  0x19   :  { %v773_v24 = vld [vmem:[%s1130_s1 + $0x98] sm:$0xff]  ;;  %v59_v25 = vld [vmem:[%s1130_s1 + $0x108] sm:$0xff]  ;;  %v506_v26 = vpack.c.bf16 %v763_v22, %v758_v21  ;;  %v785_v28 = vld [vmem:[%s1130_s1 + $0x80] sm:$0xff] }
  0x1a   :  { %314 = vmatprep.mubr.f32.mxu1 %v59_v25  ;;  %v508_v27 = vpack.c.bf16 %v773_v24, %v768_v23  ;;  %v790_v29 = vld [vmem:[%s1130_s1 + $0x90] sm:$0xff]  ;;  %v795_v30 = vld [vmem:[%s1130_s1 + $0xa8] sm:$0xff]  ;;  %v800_v31 = vld [vmem:[%s1130_s1 + $0xb8] sm:$0xff] }
  0x1b   :  { %499 = vmatpush1.bf16.msra.mxu0 %v498_v13  ;;  %573 = vmatpush1.bf16.msra.mxu1 %v498_v13  ;;  %v510_v32 = vpack.c.bf16 %v790_v29, %v785_v28  ;;  %v512_v33 = vpack.c.bf16 %v800_v31, %v795_v30  ;;  %v809_v34 = vld [vmem:[%s1130_s1 + $0xa0] sm:$0xff]  ;;  %v814_v35 = vld [vmem:[%s1130_s1 + $0xb0] sm:$0xff]  ;;  %v819_v36 = vld [vmem:[%s1130_s1 + $0xc8] sm:$0xff] }
  0x1c   :  { %501 = vmatprep.subr.bf16.mxu0 %v500_v14  ;;  %558 = vmatprep.subr.bf16.mxu1 %v500_v14  ;;  %v824_v37 = vld [vmem:[%s1130_s1 + $0xd8] sm:$0xff]  ;;  %v514_v38 = vpack.c.bf16 %v814_v35, %v809_v34  ;;  %v833_v40 = vld [vmem:[%s1130_s1 + $0xc0] sm:$0xff]  ;;  %v838_v41 = vld [vmem:[%s1130_s1 + $0xd0] sm:$0xff] }
  0x1d   :  { %v516_v39 = vpack.c.bf16 %v824_v37, %v819_v36  ;;  %v843_v42 = vld [vmem:[%s1130_s1 + $0xe8] sm:$0xff]  ;;  %v848_v43 = vld [vmem:[%s1130_s1 + $0xf8] sm:$0xff]  ;;  %v518_v44 = vpack.c.bf16 %v838_v41, %v833_v40  ;;  %v857_v46 = vld [vmem:[%s1130_s1 + $0xe0] sm:$0xff] }
  0x1e   :  { %1134 = vst [vmem:[#allocation8_spill] sm:$0xff] %v848_v43  ;;  %v520_v45 = vpack.c.bf16 %v848_v43, %v843_v42  ;;  %v862_v47 = vld [vmem:[%s1130_s1 + $0xf0] sm:$0xff]  ;;  %v867_v48 = vld [vmem:[%s1130_s1 + $0x118] sm:$0xff]  ;;  %v875_v51 = vld [vmem:[%s1130_s1 + $0x100] sm:$0xff] }
  0x1f   :  { %503 = vmatpush1.bf16.msra.mxu0 %v502_v19  ;;  %574 = vmatpush1.bf16.msra.mxu1 %v502_v19  ;;  %1135 = vst [vmem:[#allocation9_spill] sm:$0xff] %v862_v47  ;;  %v522_v49 = vpack.c.bf16 %v862_v47, %v857_v46  ;;  %v524_v50 = vpack.c.bf16 %v867_v48, %v59_v25  ;;  %v880_v52 = vld [vmem:[%s1130_s1 + $0x110] sm:$0xff]  ;;  %v885_v53 = vld [vmem:[%s1130_s1 + $0x128] sm:$0xff]  ;;  %v890_v54 = vld [vmem:[%s1130_s1 + $0x138] sm:$0xff] }
  0x20   :  { %505 = vmatprep.subr.bf16.mxu0 %v504_v20  ;;  %559 = vmatprep.subr.bf16.mxu1 %v504_v20  ;;  %v526_v55 = vpack.c.bf16 %v880_v52, %v875_v51  ;;  %v528_v56 = vpack.c.bf16 %v890_v54, %v885_v53  ;;  %v899_v57 = vld [vmem:[%s1130_s1 + $0x120] sm:$0xff]  ;;  %v904_v58 = vld [vmem:[%s1130_s1 + $0x130] sm:$0xff]  ;;  %v909_v59 = vld [vmem:[%s1130_s1 + $0x148] sm:$0xff] }
  0x21   :  { %v914_v60 = vld [vmem:[%s1130_s1 + $0x158] sm:$0xff]  ;;  %v530_v61 = vpack.c.bf16 %v904_v58, %v899_v57  ;;  %v923_v63 = vld [vmem:[%s1130_s1 + $0x140] sm:$0xff]  ;;  %v928_v0 = vld [vmem:[%s1130_s1 + $0x150] sm:$0xff] }
  0x22   :  { %v532_v62 = vpack.c.bf16 %v914_v60, %v909_v59  ;;  %v933_v3 = vld [vmem:[%s1130_s1 + $0x168] sm:$0xff]  ;;  %v938_v7 = vld [vmem:[%s1130_s1 + $0x178] sm:$0xff]  ;;  %v534_v8 = vpack.c.bf16 %v928_v0, %v923_v63  ;;  %v947_v14 = vld [vmem:[%s1130_s1 + $0x160] sm:$0xff] }
  0x23   :  { %507 = vmatpush1.bf16.msra.mxu0 %v506_v26  ;;  %575 = vmatpush1.bf16.msra.mxu1 %v506_v26  ;;  %v536_v13 = vpack.c.bf16 %v938_v7, %v933_v3  ;;  %v952_v19 = vld [vmem:[%s1130_s1 + $0x170] sm:$0xff]  ;;  %v957_v20 = vld [vmem:[%s1130_s1 + $0x188] sm:$0xff]  ;;  %v962_v25 = vld [vmem:[%s1130_s1 + $0x198] sm:$0xff] }
  0x24   :  { %509 = vmatprep.subr.bf16.mxu0 %v508_v27  ;;  %560 = vmatprep.subr.bf16.mxu1 %v508_v27  ;;  %v538_v26 = vpack.c.bf16 %v952_v19, %v947_v14  ;;  %v540_v27 = vpack.c.bf16 %v962_v25, %v957_v20  ;;  %v1043_v47 = vld [vmem:[%s1130_s1 + $0x1e0] sm:$0xff]  ;;  %v1048_v43 = vld [vmem:[%s1130_s1 + $0x1f0] sm:$0xff] }
  0x27   :  { %511 = vmatpush1.bf16.msra.mxu0 %v510_v32  ;;  %576 = vmatpush1.bf16.msra.mxu1 %v510_v32  ;;  %v971_v32 = vld [vmem:[%s1130_s1 + $0x180] sm:$0xff] }
  0x28   :  { %513 = vmatprep.subr.bf16.mxu0 %v512_v33  ;;  %561 = vmatprep.subr.bf16.mxu1 %v512_v33  ;;  %v976_v33 = vld [vmem:[%s1130_s1 + $0x190] sm:$0xff] }
  0x2b   :  { %515 = vmatpush1.bf16.msra.mxu0 %v514_v38  ;;  %577 = vmatpush1.bf16.msra.mxu1 %v514_v38  ;;  %v981_v38 = vld [vmem:[%s1130_s1 + $0x1a8] sm:$0xff] }
  0x2c   :  { %517 = vmatprep.subr.bf16.mxu0 %v516_v39  ;;  %562 = vmatprep.subr.bf16.mxu1 %v516_v39  ;;  %v986_v39 = vld [vmem:[%s1130_s1 + $0x1b8] sm:$0xff] }
  0x2f   :  { %519 = vmatpush1.bf16.msra.mxu0 %v518_v44  ;;  %578 = vmatpush1.bf16.msra.mxu1 %v518_v44  ;;  %v542_v44 = vpack.c.bf16 %v976_v33, %v971_v32 }
  0x30   :  { %521 = vmatprep.subr.bf16.mxu0 %v520_v45  ;;  %563 = vmatprep.subr.bf16.mxu1 %v520_v45  ;;  %v544_v45 = vpack.c.bf16 %v986_v39, %v981_v38 }
  0x33   :  { %523 = vmatpush1.bf16.msra.mxu0 %v522_v49  ;;  %579 = vmatpush1.bf16.msra.mxu1 %v522_v49  ;;  %v995_v49 = vld [vmem:[%s1130_s1 + $0x1a0] sm:$0xff] }
  0x34   :  { %525 = vmatprep.subr.bf16.mxu0 %v524_v50  ;;  %564 = vmatprep.subr.bf16.mxu1 %v524_v50  ;;  %v1000_v50 = vld [vmem:[%s1130_s1 + $0x1b0] sm:$0xff] }
  0x37   :  { %527 = vmatpush1.bf16.msra.mxu0 %v526_v55  ;;  %580 = vmatpush1.bf16.msra.mxu1 %v526_v55  ;;  %v1005_v55 = vld [vmem:[%s1130_s1 + $0x1c8] sm:$0xff] }
  0x38   :  { %529 = vmatprep.subr.bf16.mxu0 %v528_v56  ;;  %565 = vmatprep.subr.bf16.mxu1 %v528_v56  ;;  %v1010_v56 = vld [vmem:[%s1130_s1 + $0x1d8] sm:$0xff] }
  0x3b   :  { %531 = vmatpush1.bf16.msra.mxu0 %v530_v61  ;;  %581 = vmatpush1.bf16.msra.mxu1 %v530_v61  ;;  %v546_v61 = vpack.c.bf16 %v1000_v50, %v995_v49 }
  0x3c   :  { %533 = vmatprep.subr.bf16.mxu0 %v532_v62  ;;  %566 = vmatprep.subr.bf16.mxu1 %v532_v62  ;;  %v548_v62 = vpack.c.bf16 %v1010_v56, %v1005_v55 }
  0x3f   :  { %535 = vmatpush1.bf16.msra.mxu0 %v534_v8  ;;  %582 = vmatpush1.bf16.msra.mxu1 %v534_v8  ;;  %v1019_v8 = vld [vmem:[%s1130_s1 + $0x1c0] sm:$0xff] }
  0x40   :  { %537 = vmatprep.subr.bf16.mxu0 %v536_v13  ;;  %567 = vmatprep.subr.bf16.mxu1 %v536_v13  ;;  %v1024_v13 = vld [vmem:[%s1130_s1 + $0x1d0] sm:$0xff] }
  0x43   :  { %539 = vmatpush1.bf16.msra.mxu0 %v538_v26  ;;  %583 = vmatpush1.bf16.msra.mxu1 %v538_v26  ;;  %v1029_v26 = vld [vmem:[%s1130_s1 + $0x1e8] sm:$0xff] }
  0x44   :  { %541 = vmatprep.subr.bf16.mxu0 %v540_v27  ;;  %568 = vmatprep.subr.bf16.mxu1 %v540_v27  ;;  %v1034_v27 = vld [vmem:[%s1130_s1 + $0x1f8] sm:$0xff]  ;;  %s643_s1 = smov [#allocation5]  }
  0x45   :  { %s480_s14 = sshll.u32 %s643_s1, 4  ;;  %s481_s14 = int_to_ptr.vmem [resolvable:$true] %s480_s14 }
  0x46   :  { %s614_s15 = scalar_lea.vmem %s481_s14, 8192  ;;  %p619_p9 = scmp.lt.s32.totalorder %s481_s14, %s481_s14 }
  0x47   :  { %543 = vmatpush1.bf16.msra.mxu0 %v542_v44  ;;  %584 = vmatpush1.bf16.msra.mxu1 %v542_v44  ;;  %v550_v44 = vpack.c.bf16 %v1024_v13, %v1019_v8  ;;  %p615_p8 = scmp.ne.s32.totalorder %s481_s14, %s614_s15  ;;  %p620_p10 = scmp.lt.s32.totalorder %s614_s15, %s614_s15 }
  0x48   :  { %545 = vmatprep.subr.bf16.mxu0 %v544_v45  ;;  %569 = vmatprep.subr.bf16.mxu1 %v544_v45  ;;  %v552_v45 = vpack.c.bf16 %v1034_v27, %v1029_v26 }
  0x49   :  { %p621_p11 = por %p620_p10, %p619_p9 }
  0x4b   :  { %547 = vmatpush1.bf16.msra.mxu0 %v546_v61  ;;  %585 = vmatpush1.bf16.msra.mxu1 %v546_v61  ;;  %v554_v61 = vpack.c.bf16 %v1048_v43, %v1043_v47  ;;  %p622_p12 = pnand %p621_p11, %p615_p8 }
  0x4c   :  { %549 = vmatprep.subr.bf16.mxu0 %v548_v62  ;;  %570 = vmatprep.subr.bf16.mxu1 %v548_v62 }
  0x4f   :  { %551 = vmatpush1.bf16.msra.mxu0 %v550_v44  ;;  %586 = vmatpush1.bf16.msra.mxu1 %v550_v44 }
  0x50   :  { %553 = vmatprep.subr.bf16.mxu0 %v552_v45  ;;  %571 = vmatprep.subr.bf16.mxu1 %v552_v45  ;;  %v100_v45 = vld [vmem:[#allocation2 + $0x50] sm:$0xff] }
  0x53   :  { %555 = vmatpush1.bf16.msra.mxu0 %v554_v61  ;;  %587 = vmatpush1.bf16.msra.mxu1 %v554_v61  ;;  %v132_v61 = vld [vmem:[#allocation2 + $0x150] sm:$0xff] }
  0x56   :  { %219 = vmatmul.mubr.f32.vlgmr.msra.gmra.mrb[0].mxu0 %v685_v2  ;;  %315 = vmatmul.mubr.f32.vlgmr.msra.gmra.mrb[0].mxu1 %v875_v51  ;;  %v1137_v2 = vld [vmem:[#allocation9_spill] sm:$0xff] }
  0x57   :  { %224 = vmatprep.mubr.f32.mxu0 %v680_v1  ;;  %320 = vmatprep.mubr.f32.mxu1 %v867_v48  ;;  %v1136_v1 = vld [vmem:[#allocation8_spill] sm:$0xff] }
  0x5a   :  { %225 = vmatmul.mubr.f32.gmra.mrb[2].mxu0 %v691_v4  ;;  %321 = vmatmul.mubr.f32.gmra.mrb[2].mxu1 %v880_v52  ;;  %v90_v4 = vld [vmem:[#allocation2] sm:$0xff] }
  0x5b   :  { %230 = vmatprep.mubr.f32.mxu0 %v696_v5  ;;  %326 = vmatprep.mubr.f32.mxu1 %v885_v53  ;;  %v122_v5 = vld [vmem:[#allocation2 + $0x100] sm:$0xff] }
  0x5e   :  { %231 = vmatmul.mubr.f32.gmra.mrb[4].mxu0 %v710_v9  ;;  %327 = vmatmul.mubr.f32.gmra.mrb[4].mxu1 %v899_v57  ;;  %v123_v9 = vld [vmem:[#allocation2 + $0x108] sm:$0xff] }
  0x5f   :  { %236 = vmatprep.mubr.f32.mxu0 %v701_v6  ;;  %332 = vmatprep.mubr.f32.mxu1 %v890_v54  ;;  %v91_v6 = vld [vmem:[#allocation2 + $0x8] sm:$0xff] }
  0x62   :  { %237 = vmatmul.mubr.f32.gmra.mrb[6].mxu0 %v715_v10  ;;  %333 = vmatmul.mubr.f32.gmra.mrb[6].mxu1 %v904_v58 }
  0x63   :  { %242 = vmatprep.mubr.f32.mxu0 %v720_v11  ;;  %338 = vmatprep.mubr.f32.mxu1 %v909_v59  ;;  %v96_v59 = vld [vmem:[#allocation2 + $0x30] sm:$0xff] }
  0x66   :  { %243 = vmatmul.mubr.f32.gmra.mrb[8].mxu0 %v734_v15  ;;  %339 = vmatmul.mubr.f32.gmra.mrb[8].mxu1 %v923_v63  ;;  %v97_v63 = vld [vmem:[#allocation2 + $0x38] sm:$0xff] }
  0x67   :  { %248 = vmatprep.mubr.f32.mxu0 %v725_v12  ;;  %344 = vmatprep.mubr.f32.mxu1 %v914_v60  ;;  %v128_v60 = vld [vmem:[#allocation2 + $0x130] sm:$0xff] }
  0x6a   :  { %249 = vmatmul.mubr.f32.gmra.mrb[10].mxu0 %v739_v16  ;;  %345 = vmatmul.mubr.f32.gmra.mrb[10].mxu1 %v928_v0  ;;  %v129_v0 = vld [vmem:[#allocation2 + $0x138] sm:$0xff] }
  0x6b   :  { %254 = vmatprep.mubr.f32.mxu0 %v744_v17  ;;  %350 = vmatprep.mubr.f32.mxu1 %v933_v3 }
  0x6e   :  { %255 = vmatmul.mubr.f32.gmra.mrb[12].mxu0 %v758_v21  ;;  %351 = vmatmul.mubr.f32.gmra.mrb[12].mxu1 %v947_v14 }
  0x6f   :  { %260 = vmatprep.mubr.f32.mxu0 %v749_v18  ;;  %356 = vmatprep.mubr.f32.mxu1 %v938_v7 }
  0x72   :  { %261 = vmatmul.mubr.f32.gmra.mrb[14].mxu0 %v763_v22  ;;  %357 = vmatmul.mubr.f32.gmra.mrb[14].mxu1 %v952_v19  ;;  %v92_v22 = vld [vmem:[#allocation2 + $0x10] sm:$0xff] }
  0x73   :  { %266 = vmatprep.mubr.f32.mxu0 %v768_v23  ;;  %362 = vmatprep.mubr.f32.mxu1 %v957_v20  ;;  %v124_v23 = vld [vmem:[#allocation2 + $0x110] sm:$0xff] }
  0x76   :  { %267 = vmatmul.mubr.f32.gmra.mrb[16].mxu0 %v785_v28  ;;  %363 = vmatmul.mubr.f32.gmra.mrb[16].mxu1 %v971_v32  ;;  %v125_v28 = vld [vmem:[#allocation2 + $0x118] sm:$0xff] }
  0x77   :  { %272 = vmatprep.mubr.f32.mxu0 %v773_v24  ;;  %368 = vmatprep.mubr.f32.mxu1 %v962_v25  ;;  %v93_v24 = vld [vmem:[#allocation2 + $0x18] sm:$0xff] }
  0x7a   :  { %273 = vmatmul.mubr.f32.gmra.mrb[18].mxu0 %v790_v29  ;;  %369 = vmatmul.mubr.f32.gmra.mrb[18].mxu1 %v976_v33 }
  0x7b   :  { %278 = vmatprep.mubr.f32.mxu0 %v795_v30  ;;  %374 = vmatprep.mubr.f32.mxu1 %v981_v38  ;;  %v98_v38 = vld [vmem:[#allocation2 + $0x40] sm:$0xff] }
  0x7e   :  { %279 = vmatmul.mubr.f32.gmra.mrb[20].mxu0 %v809_v34  ;;  %375 = vmatmul.mubr.f32.gmra.mrb[20].mxu1 %v995_v49  ;;  %v99_v49 = vld [vmem:[#allocation2 + $0x48] sm:$0xff] }
  0x7f   :  { %284 = vmatprep.mubr.f32.mxu0 %v800_v31  ;;  %380 = vmatprep.mubr.f32.mxu1 %v986_v39  ;;  %v130_v39 = vld [vmem:[#allocation2 + $0x140] sm:$0xff] }
  0x82   :  { %285 = vmatmul.mubr.f32.gmra.mrb[22].mxu0 %v814_v35  ;;  %381 = vmatmul.mubr.f32.gmra.mrb[22].mxu1 %v1000_v50  ;;  %v131_v50 = vld [vmem:[#allocation2 + $0x148] sm:$0xff] }
  0x83   :  { %290 = vmatprep.mubr.f32.mxu0 %v819_v36  ;;  %386 = vmatprep.mubr.f32.mxu1 %v1005_v55 }
  0x86   :  { %291 = vmatmul.mubr.f32.gmra.mrb[24].mxu0 %v833_v40  ;;  %387 = vmatmul.mubr.f32.gmra.mrb[24].mxu1 %v1019_v8 }
  0x87   :  { %296 = vmatprep.mubr.f32.mxu0 %v824_v37  ;;  %392 = vmatprep.mubr.f32.mxu1 %v1010_v56 }
  0x8a   :  { %297 = vmatmul.mubr.f32.gmra.mrb[26].mxu0 %v838_v41  ;;  %393 = vmatmul.mubr.f32.gmra.mrb[26].mxu1 %v1024_v13  ;;  %v94_v41 = vld [vmem:[#allocation2 + $0x20] sm:$0xff] }
  0x8b   :  { %302 = vmatprep.mubr.f32.mxu0 %v843_v42  ;;  %398 = vmatprep.mubr.f32.mxu1 %v1029_v26  ;;  %v126_v42 = vld [vmem:[#allocation2 + $0x120] sm:$0xff] }
  0x8e   :  { %303 = vmatmul.mubr.f32.gmra.mrb[28].mxu0 %v857_v46  ;;  %399 = vmatmul.mubr.f32.gmra.mrb[28].mxu1 %v1043_v47  ;;  %v127_v46 = vld [vmem:[#allocation2 + $0x128] sm:$0xff] }
  0x8f   :  { %308 = vmatprep.mubr.f32.mxu0 %v1136_v1  ;;  %404 = vmatprep.mubr.f32.mxu1 %v1034_v27  ;;  %v101_v1 = vld [vmem:[#allocation2 + $0x58] sm:$0xff] }
  0x92   :  { %309 = vmatmul.mubr.f32.gmra.mrb[30].mxu0 %v1137_v2  ;;  %405 = vmatmul.mubr.f32.gmra.mrb[30].mxu1 %v1048_v43  ;;  %v95_v43 = vld [vmem:[#allocation2 + $0x28] sm:$0xff]  ;;  %v133_v2 = vld [vmem:[#allocation2 + $0x158] sm:$0xff] }
 0x129   :  { %v220_v10 = vpop.f32.mrb[0].mxu0  ;;  %v316_v11 = vpop.f32.mrb[0].mxu1 }
 0x12a   :  { %v221_v12 = vadd.f32 %v220_v10, %v90_v4  ;;  %v317_v15 = vadd.f32 %v316_v11, %v122_v5  ;;  %v222_v16 = vpop.f32.mrb[1].mxu0  ;;  %v318_v17 = vpop.f32.mrb[1].mxu1 }
 0x12b   :  { %v223_v18 = vadd.f32 %v222_v16, %v91_v6  ;;  %v319_v21 = vadd.f32 %v318_v17, %v123_v9  ;;  %v102_v16 = vld [vmem:[#allocation2 + $0x60] sm:$0xff] }
 0x12c   :  { %411 = vst [vmem:[#allocation5] sm:$0xff] %v221_v12  ;;  %443 = vst [vmem:[#allocation5 + $0x100] sm:$0xff] %v317_v15  ;;  %v134_v17 = vld [vmem:[#allocation2 + $0x160] sm:$0xff] }
 0x12d   :  { %412 = vst [vmem:[#allocation5 + $0x8] sm:$0xff] %v223_v18  ;;  %444 = vst [vmem:[#allocation5 + $0x108] sm:$0xff] %v319_v21  ;;  %v226_v29 = vpop.f32.mrb[2].mxu0  ;;  %v322_v30 = vpop.f32.mrb[2].mxu1  ;;  %v103_v18 = vld [vmem:[#allocation2 + $0x68] sm:$0xff] }
 0x12e   :  { %v227_v31 = vadd.f32 %v226_v29, %v92_v22  ;;  %v323_v34 = vadd.f32 %v322_v30, %v124_v23  ;;  %v228_v35 = vpop.f32.mrb[3].mxu0  ;;  %v324_v36 = vpop.f32.mrb[3].mxu1  ;;  %v135_v21 = vld [vmem:[#allocation2 + $0x168] sm:$0xff] }
 0x12f   :  { %v229_v37 = vadd.f32 %v228_v35, %v93_v24  ;;  %v325_v40 = vadd.f32 %v324_v36, %v125_v28  ;;  %v104_v35 = vld [vmem:[#allocation2 + $0x70] sm:$0xff] }
 0x130   :  { %413 = vst [vmem:[#allocation5 + $0x10] sm:$0xff] %v227_v31  ;;  %445 = vst [vmem:[#allocation5 + $0x110] sm:$0xff] %v323_v34  ;;  %v136_v36 = vld [vmem:[#allocation2 + $0x170] sm:$0xff] }
 0x131   :  { %414 = vst [vmem:[#allocation5 + $0x18] sm:$0xff] %v229_v37  ;;  %446 = vst [vmem:[#allocation5 + $0x118] sm:$0xff] %v325_v40  ;;  %v232_v47 = vpop.f32.mrb[4].mxu0  ;;  %v328_v48 = vpop.f32.mrb[4].mxu1  ;;  %v105_v37 = vld [vmem:[#allocation2 + $0x78] sm:$0xff] }
 0x132   :  { %v233_v51 = vadd.f32 %v232_v47, %v94_v41  ;;  %v329_v52 = vadd.f32 %v328_v48, %v126_v42  ;;  %v234_v53 = vpop.f32.mrb[5].mxu0  ;;  %v330_v54 = vpop.f32.mrb[5].mxu1  ;;  %v137_v40 = vld [vmem:[#allocation2 + $0x178] sm:$0xff] }
 0x133   :  { %v235_v57 = vadd.f32 %v234_v53, %v95_v43  ;;  %v331_v58 = vadd.f32 %v330_v54, %v127_v46  ;;  %v106_v53 = vld [vmem:[#allocation2 + $0x80] sm:$0xff] }
 0x134   :  { %415 = vst [vmem:[#allocation5 + $0x20] sm:$0xff] %v233_v51  ;;  %447 = vst [vmem:[#allocation5 + $0x120] sm:$0xff] %v329_v52  ;;  %v138_v54 = vld [vmem:[#allocation2 + $0x180] sm:$0xff] }
 0x135   :  { %416 = vst [vmem:[#allocation5 + $0x28] sm:$0xff] %v235_v57  ;;  %448 = vst [vmem:[#allocation5 + $0x128] sm:$0xff] %v331_v58  ;;  %v238_v3 = vpop.f32.mrb[6].mxu0  ;;  %v334_v7 = vpop.f32.mrb[6].mxu1  ;;  %v107_v57 = vld [vmem:[#allocation2 + $0x88] sm:$0xff] }
 0x136   :  { %v239_v14 = vadd.f32 %v238_v3, %v96_v59  ;;  %v335_v19 = vadd.f32 %v334_v7, %v128_v60  ;;  %v240_v20 = vpop.f32.mrb[7].mxu0  ;;  %v336_v25 = vpop.f32.mrb[7].mxu1  ;;  %v139_v58 = vld [vmem:[#allocation2 + $0x188] sm:$0xff] }
 0x137   :  { %v241_v32 = vadd.f32 %v240_v20, %v97_v63  ;;  %v337_v33 = vadd.f32 %v336_v25, %v129_v0  ;;  %v108_v20 = vld [vmem:[#allocation2 + $0x90] sm:$0xff] }
 0x138   :  { %417 = vst [vmem:[#allocation5 + $0x30] sm:$0xff] %v239_v14  ;;  %449 = vst [vmem:[#allocation5 + $0x130] sm:$0xff] %v335_v19  ;;  %v140_v25 = vld [vmem:[#allocation2 + $0x190] sm:$0xff] }
 0x139   :  { %418 = vst [vmem:[#allocation5 + $0x38] sm:$0xff] %v241_v32  ;;  %450 = vst [vmem:[#allocation5 + $0x138] sm:$0xff] %v337_v33  ;;  %v244_v55 = vpop.f32.mrb[8].mxu0  ;;  %v340_v56 = vpop.f32.mrb[8].mxu1  ;;  %v109_v32 = vld [vmem:[#allocation2 + $0x98] sm:$0xff] }
 0x13a   :  { %v245_v62 = vadd.f32 %v244_v55, %v98_v38  ;;  %v341_v8 = vadd.f32 %v340_v56, %v130_v39  ;;  %v246_v13 = vpop.f32.mrb[9].mxu0  ;;  %v342_v26 = vpop.f32.mrb[9].mxu1  ;;  %v141_v33 = vld [vmem:[#allocation2 + $0x198] sm:$0xff] }
 0x13b   :  { %v247_v27 = vadd.f32 %v246_v13, %v99_v49  ;;  %v343_v44 = vadd.f32 %v342_v26, %v131_v50  ;;  %v110_v13 = vld [vmem:[#allocation2 + $0xa0] sm:$0xff] }
 0x13c   :  { %419 = vst [vmem:[#allocation5 + $0x40] sm:$0xff] %v245_v62  ;;  %451 = vst [vmem:[#allocation5 + $0x140] sm:$0xff] %v341_v8  ;;  %v142_v26 = vld [vmem:[#allocation2 + $0x1a0] sm:$0xff] }
 0x13d   :  { %420 = vst [vmem:[#allocation5 + $0x48] sm:$0xff] %v247_v27  ;;  %452 = vst [vmem:[#allocation5 + $0x148] sm:$0xff] %v343_v44  ;;  %v250_v4 = vpop.f32.mrb[10].mxu0  ;;  %v346_v5 = vpop.f32.mrb[10].mxu1  ;;  %v111_v27 = vld [vmem:[#allocation2 + $0xa8] sm:$0xff] }
 0x13e   :  { %v251_v6 = vadd.f32 %v250_v4, %v100_v45  ;;  %v347_v9 = vadd.f32 %v346_v5, %v132_v61  ;;  %v252_v10 = vpop.f32.mrb[11].mxu0  ;;  %v348_v11 = vpop.f32.mrb[11].mxu1  ;;  %v143_v44 = vld [vmem:[#allocation2 + $0x1a8] sm:$0xff] }
 0x13f   :  { %v253_v12 = vadd.f32 %v252_v10, %v101_v1  ;;  %v349_v15 = vadd.f32 %v348_v11, %v133_v2  ;;  %v112_v10 = vld [vmem:[#allocation2 + $0xb0] sm:$0xff] }
 0x140   :  { %421 = vst [vmem:[#allocation5 + $0x50] sm:$0xff] %v251_v6  ;;  %453 = vst [vmem:[#allocation5 + $0x150] sm:$0xff] %v347_v9  ;;  %v144_v11 = vld [vmem:[#allocation2 + $0x1b0] sm:$0xff] }
 0x141   :  { %422 = vst [vmem:[#allocation5 + $0x58] sm:$0xff] %v253_v12  ;;  %454 = vst [vmem:[#allocation5 + $0x158] sm:$0xff] %v349_v15  ;;  %v256_v22 = vpop.f32.mrb[12].mxu0  ;;  %v352_v23 = vpop.f32.mrb[12].mxu1  ;;  %v113_v12 = vld [vmem:[#allocation2 + $0xb8] sm:$0xff] }
 0x142   :  { %v257_v24 = vadd.f32 %v256_v22, %v102_v16  ;;  %v353_v28 = vadd.f32 %v352_v23, %v134_v17  ;;  %v258_v29 = vpop.f32.mrb[13].mxu0  ;;  %v354_v30 = vpop.f32.mrb[13].mxu1  ;;  %v145_v15 = vld [vmem:[#allocation2 + $0x1b8] sm:$0xff] }
 0x143   :  { %v259_v31 = vadd.f32 %v258_v29, %v103_v18  ;;  %v355_v34 = vadd.f32 %v354_v30, %v135_v21  ;;  %v114_v29 = vld [vmem:[#allocation2 + $0xc0] sm:$0xff] }
 0x144   :  { %423 = vst [vmem:[#allocation5 + $0x60] sm:$0xff] %v257_v24  ;;  %455 = vst [vmem:[#allocation5 + $0x160] sm:$0xff] %v353_v28  ;;  %v146_v30 = vld [vmem:[#allocation2 + $0x1c0] sm:$0xff] }
 0x145   :  { %424 = vst [vmem:[#allocation5 + $0x68] sm:$0xff] %v259_v31  ;;  %456 = vst [vmem:[#allocation5 + $0x168] sm:$0xff] %v355_v34  ;;  %v262_v41 = vpop.f32.mrb[14].mxu0  ;;  %v358_v42 = vpop.f32.mrb[14].mxu1  ;;  %v115_v31 = vld [vmem:[#allocation2 + $0xc8] sm:$0xff] }
 0x146   :  { %v263_v43 = vadd.f32 %v262_v41, %v104_v35  ;;  %v359_v46 = vadd.f32 %v358_v42, %v136_v36  ;;  %v264_v47 = vpop.f32.mrb[15].mxu0  ;;  %v360_v48 = vpop.f32.mrb[15].mxu1  ;;  %v147_v34 = vld [vmem:[#allocation2 + $0x1c8] sm:$0xff] }
 0x147   :  { %v265_v51 = vadd.f32 %v264_v47, %v105_v37  ;;  %v361_v52 = vadd.f32 %v360_v48, %v137_v40  ;;  %v116_v47 = vld [vmem:[#allocation2 + $0xd0] sm:$0xff] }
 0x148   :  { %425 = vst [vmem:[#allocation5 + $0x70] sm:$0xff] %v263_v43  ;;  %457 = vst [vmem:[#allocation5 + $0x170] sm:$0xff] %v359_v46  ;;  %v148_v48 = vld [vmem:[#allocation2 + $0x1d0] sm:$0xff] }
 0x149   :  { %426 = vst [vmem:[#allocation5 + $0x78] sm:$0xff] %v265_v51  ;;  %458 = vst [vmem:[#allocation5 + $0x178] sm:$0xff] %v361_v52  ;;  %v268_v59 = vpop.f32.mrb[16].mxu0  ;;  %v364_v60 = vpop.f32.mrb[16].mxu1  ;;  %v117_v51 = vld [vmem:[#allocation2 + $0xd8] sm:$0xff] }
 0x14a   :  { %v269_v63 = vadd.f32 %v268_v59, %v106_v53  ;;  %v365_v0 = vadd.f32 %v364_v60, %v138_v54  ;;  %v270_v3 = vpop.f32.mrb[17].mxu0  ;;  %v366_v7 = vpop.f32.mrb[17].mxu1  ;;  %v149_v52 = vld [vmem:[#allocation2 + $0x1d8] sm:$0xff] }
 0x14b   :  { %v271_v14 = vadd.f32 %v270_v3, %v107_v57  ;;  %v367_v19 = vadd.f32 %v366_v7, %v139_v58  ;;  %v118_v3 = vld [vmem:[#allocation2 + $0xe0] sm:$0xff] }
 0x14c   :  { %427 = vst [vmem:[#allocation5 + $0x80] sm:$0xff] %v269_v63  ;;  %459 = vst [vmem:[#allocation5 + $0x180] sm:$0xff] %v365_v0  ;;  %v150_v7 = vld [vmem:[#allocation2 + $0x1e0] sm:$0xff] }
 0x14d   :  { %428 = vst [vmem:[#allocation5 + $0x88] sm:$0xff] %v271_v14  ;;  %460 = vst [vmem:[#allocation5 + $0x188] sm:$0xff] %v367_v19  ;;  %v274_v38 = vpop.f32.mrb[18].mxu0  ;;  %v370_v39 = vpop.f32.mrb[18].mxu1  ;;  %v119_v14 = vld [vmem:[#allocation2 + $0xe8] sm:$0xff] }
 0x14e   :  { %v275_v49 = vadd.f32 %v274_v38, %v108_v20  ;;  %v371_v50 = vadd.f32 %v370_v39, %v140_v25  ;;  %v276_v55 = vpop.f32.mrb[19].mxu0  ;;  %v372_v56 = vpop.f32.mrb[19].mxu1  ;;  %v151_v19 = vld [vmem:[#allocation2 + $0x1e8] sm:$0xff] }
 0x14f   :  { %v277_v62 = vadd.f32 %v276_v55, %v109_v32  ;;  %v373_v8 = vadd.f32 %v372_v56, %v141_v33  ;;  %v120_v55 = vld [vmem:[#allocation2 + $0xf0] sm:$0xff] }
 0x150   :  { %429 = vst [vmem:[#allocation5 + $0x90] sm:$0xff] %v275_v49  ;;  %461 = vst [vmem:[#allocation5 + $0x190] sm:$0xff] %v371_v50  ;;  %v152_v56 = vld [vmem:[#allocation2 + $0x1f0] sm:$0xff] }
 0x151   :  { %430 = vst [vmem:[#allocation5 + $0x98] sm:$0xff] %v277_v62  ;;  %462 = vst [vmem:[#allocation5 + $0x198] sm:$0xff] %v373_v8  ;;  %v280_v45 = vpop.f32.mrb[20].mxu0  ;;  %v376_v61 = vpop.f32.mrb[20].mxu1  ;;  %v121_v62 = vld [vmem:[#allocation2 + $0xf8] sm:$0xff] }
 0x152   :  { %v281_v1 = vadd.f32 %v280_v45, %v110_v13  ;;  %v377_v2 = vadd.f32 %v376_v61, %v142_v26  ;;  %v282_v4 = vpop.f32.mrb[21].mxu0  ;;  %v378_v5 = vpop.f32.mrb[21].mxu1  ;;  %v153_v8 = vld [vmem:[#allocation2 + $0x1f8] sm:$0xff] }
 0x153   :  { %v283_v6 = vadd.f32 %v282_v4, %v111_v27  ;;  %v379_v9 = vadd.f32 %v378_v5, %v143_v44 }
 0x154   :  { %431 = vst [vmem:[#allocation5 + $0xa0] sm:$0xff] %v281_v1  ;;  %463 = vst [vmem:[#allocation5 + $0x1a0] sm:$0xff] %v377_v2 }
 0x155   :  { %432 = vst [vmem:[#allocation5 + $0xa8] sm:$0xff] %v283_v6  ;;  %464 = vst [vmem:[#allocation5 + $0x1a8] sm:$0xff] %v379_v9  ;;  %v286_v16 = vpop.f32.mrb[22].mxu0  ;;  %v382_v17 = vpop.f32.mrb[22].mxu1 }
 0x156   :  { %v287_v18 = vadd.f32 %v286_v16, %v112_v10  ;;  %v383_v21 = vadd.f32 %v382_v17, %v144_v11  ;;  %v288_v22 = vpop.f32.mrb[23].mxu0  ;;  %v384_v23 = vpop.f32.mrb[23].mxu1 }
 0x157   :  { %v289_v24 = vadd.f32 %v288_v22, %v113_v12  ;;  %v385_v28 = vadd.f32 %v384_v23, %v145_v15 }
 0x158   :  { %433 = vst [vmem:[#allocation5 + $0xb0] sm:$0xff] %v287_v18  ;;  %465 = vst [vmem:[#allocation5 + $0x1b0] sm:$0xff] %v383_v21 }
 0x159   :  { %434 = vst [vmem:[#allocation5 + $0xb8] sm:$0xff] %v289_v24  ;;  %466 = vst [vmem:[#allocation5 + $0x1b8] sm:$0xff] %v385_v28  ;;  %v292_v35 = vpop.f32.mrb[24].mxu0  ;;  %v388_v36 = vpop.f32.mrb[24].mxu1 }
 0x15a   :  { %v293_v37 = vadd.f32 %v292_v35, %v114_v29  ;;  %v389_v40 = vadd.f32 %v388_v36, %v146_v30  ;;  %v294_v41 = vpop.f32.mrb[25].mxu0  ;;  %v390_v42 = vpop.f32.mrb[25].mxu1 }
 0x15b   :  { %v295_v43 = vadd.f32 %v294_v41, %v115_v31  ;;  %v391_v46 = vadd.f32 %v390_v42, %v147_v34 }
 0x15c   :  { %435 = vst [vmem:[#allocation5 + $0xc0] sm:$0xff] %v293_v37  ;;  %467 = vst [vmem:[#allocation5 + $0x1c0] sm:$0xff] %v389_v40 }
 0x15d   :  { %436 = vst [vmem:[#allocation5 + $0xc8] sm:$0xff] %v295_v43  ;;  %468 = vst [vmem:[#allocation5 + $0x1c8] sm:$0xff] %v391_v46  ;;  %v298_v53 = vpop.f32.mrb[26].mxu0  ;;  %v394_v54 = vpop.f32.mrb[26].mxu1 }
 0x15e   :  { %v299_v57 = vadd.f32 %v298_v53, %v116_v47  ;;  %v395_v58 = vadd.f32 %v394_v54, %v148_v48  ;;  %v300_v59 = vpop.f32.mrb[27].mxu0  ;;  %v396_v60 = vpop.f32.mrb[27].mxu1 }
 0x15f   :  { %v301_v63 = vadd.f32 %v300_v59, %v117_v51  ;;  %v397_v0 = vadd.f32 %v396_v60, %v149_v52 }
 0x160   :  { %437 = vst [vmem:[#allocation5 + $0xd0] sm:$0xff] %v299_v57  ;;  %469 = vst [vmem:[#allocation5 + $0x1d0] sm:$0xff] %v395_v58 }
 0x161   :  { %438 = vst [vmem:[#allocation5 + $0xd8] sm:$0xff] %v301_v63  ;;  %470 = vst [vmem:[#allocation5 + $0x1d8] sm:$0xff] %v397_v0  ;;  %v304_v20 = vpop.f32.mrb[28].mxu0  ;;  %v400_v25 = vpop.f32.mrb[28].mxu1 }
 0x162   :  { %v305_v32 = vadd.f32 %v304_v20, %v118_v3  ;;  %v401_v33 = vadd.f32 %v400_v25, %v150_v7  ;;  %v306_v38 = vpop.f32.mrb[29].mxu0  ;;  %v402_v39 = vpop.f32.mrb[29].mxu1 }
 0x163   :  { %v307_v49 = vadd.f32 %v306_v38, %v119_v14  ;;  %v403_v50 = vadd.f32 %v402_v39, %v151_v19 }
 0x164   :  { %439 = vst [vmem:[#allocation5 + $0xe0] sm:$0xff] %v305_v32  ;;  %471 = vst [vmem:[#allocation5 + $0x1e0] sm:$0xff] %v401_v33 }
 0x165   :  { %440 = vst [vmem:[#allocation5 + $0xe8] sm:$0xff] %v307_v49  ;;  %472 = vst [vmem:[#allocation5 + $0x1e8] sm:$0xff] %v403_v50  ;;  %v310_v13 = vpop.f32.mrb[30].mxu0  ;;  %v406_v26 = vpop.f32.mrb[30].mxu1 }
 0x166   :  { %v311_v27 = vadd.f32 %v310_v13, %v120_v55  ;;  %v407_v44 = vadd.f32 %v406_v26, %v152_v56  ;;  %v312_v45 = vpop.f32.mrb[31].mxu0  ;;  %v408_v61 = vpop.f32.mrb[31].mxu1 }
 0x167   :  { %v313_v1 = vadd.f32 %v312_v45, %v121_v62  ;;  %v409_v2 = vadd.f32 %v408_v61, %v153_v8 }
 0x168   :  { %441 = vst [vmem:[#allocation5 + $0xf0] sm:$0xff] %v311_v27  ;;  %473 = vst [vmem:[#allocation5 + $0x1f0] sm:$0xff] %v407_v44 }
 0x169   :  { %442 = vst [vmem:[#allocation5 + $0xf8] sm:$0xff] %v313_v1  ;;  %474 = vst [vmem:[#allocation5 + $0x1f8] sm:$0xff] %v409_v2 }
 0x16a   :  { %625 = shalt.err (!%p622_p12)
}
 0x16b   :  { %s626_s18 = scalar_lea.hbm %s1131_s2, 8192 }
 0x16c   :  { %p627_p13 = scmp.ne.s32.totalorder %s1131_s2, %s626_s18  ;;  %p630_p0 = scmp.lt.u32.totalorder %s626_s18, %s1131_s2 }
 0x16e   :  { %p632_p1 = pnand %p630_p0, %p627_p13 }
 0x170   :  { %635 = shalt.err (!%p632_p1)
}
 0x171   :  { %486 = dma.vmem_to_hbm [thread:$0]  %s481_s14, 8192, %s1131_s2, [#allocation4], %s641_s19, %s641_s19, %s642_s20  }
 0x172   :  { %638 = dma.done.wait [#allocation4], 8192  }
 0x173   :  { %639 = vsyncadd [#allocation4], 4294959104 }
 0x174   :  { %490 = vsyncpa [#allocation3], 1 }
 0x175   :  { %491 = vsyncpa [#allocation4], 1 }

</bundles_post_ra>
